<compile_context>
chip_gen: v7x
topology: tpu7x:2x2x1
jax: 0.10.0
libtpu: 0.0.40
codegen_flags: <defaults>
</compile_context>

<pallas_src>
import functools

import jax
import jax.numpy as jnp
from jax.experimental import pallas as pl
from jax.experimental.pallas import tpu as pltpu


def mlp_kernel(x_ref, w1_ref, b1_ref, w2_ref, b2_ref, w3_ref, b3_ref, o_ref):
    x = x_ref[...]                                   # (TB, 4) float32

    # ---- Layer 1: Linear(4 -> 64) + ReLU.  K=4 is degenerate for the MXU but
    # the MXU is idle here and a single dot avoids the per-k cross-lane
    # broadcast the VPU formulation required.
    h1 = jnp.dot(x, w1_ref[...], preferred_element_type=jnp.float32) + b1_ref[...]
    h1 = jnp.maximum(h1, 0.0)

    # ---- Layer 2: Linear(64 -> 64) + ReLU (MXU).
    h2 = jnp.dot(h1, w2_ref[...], preferred_element_type=jnp.float32) + b2_ref[...]
    h2 = jnp.maximum(h2, 0.0)

    # ---- Layer 3: Linear(64 -> 2).  Output block last dim == full array dim
    # (2), so HBM writeback is exactly the logical 8 B/row — no padding traffic
    # and no wrapper slice pass over the output columns.
    out = jnp.dot(h2, w3_ref[...], preferred_element_type=jnp.float32) + b3_ref[...]
    o_ref[...] = out.astype(o_ref.dtype)


def _round_up(n, m):
    return ((n + m - 1) // m) * m


@functools.partial(jax.jit, static_argnames=("tile_b",))
def net_forward(x, params, *, tile_b=2048):
    """x: (B, 4) float32; params: dict of weights/biases. Returns (B, 2)."""
    B = x.shape[0]
    # Tile selection:
    #  * B >= 2*tile_b : big tiles to amortize per-grid-step overhead.
    #  * 16 <= B       : split into >= 2 grid steps so v7x's 2 TensorCores both
    #                    get work (harmless extra step on v5e/v6e).
    #  * tiny B        : one step, rounded up to the sublane multiple (8).
    if B >= 2 * tile_b:
        TB = tile_b
    elif B >= 16:
        TB = _round_up((B + 1) // 2, 8)
    else:
        TB = _round_up(B, 8)
    Bp = pl.cdiv(B, TB) * TB
    if Bp != B:
        x = jnp.pad(x, ((0, Bp - B), (0, 0)))

    const = lambda i: (0, 0)  # weights/biases: same block every step (stay VMEM-resident)

    out = pl.pallas_call(
        mlp_kernel,
        out_shape=jax.ShapeDtypeStruct((Bp, 2), jnp.float32),
        grid=(Bp // TB,),
        in_specs=[
            pl.BlockSpec((TB, 4), lambda i: (i, 0)),        # x tile (pipelined)
            pl.BlockSpec((4, 64), const),                   # w1
            pl.BlockSpec((1, 64), const),                   # b1
            pl.BlockSpec((64, 64), const),                  # w2
            pl.BlockSpec((1, 64), const),                   # b2
            pl.BlockSpec((64, 2), const),                   # w3
            pl.BlockSpec((1, 2), const),                    # b3
        ],
        out_specs=pl.BlockSpec((TB, 2), lambda i: (i, 0)),
        compiler_params=pltpu.CompilerParams(
            dimension_semantics=("parallel",)),
    )(x, params["w1"], params["b1"], params["w2"], params["b2"],
      params["w3"], params["b3"])

    return out[:B] if Bp != B else out


def init_params(key):
    """Deterministic init mimicking PyTorch's default Linear init
    (uniform(-1/sqrt(fan_in), 1/sqrt(fan_in))). Weights stored as (in, out)."""
    def linear(k, fan_in, fan_out):
        kw, kb = jax.random.split(k)
        bound = 1.0 / jnp.sqrt(fan_in)
        w = jax.random.uniform(kw, (fan_in, fan_out), jnp.float32, -bound, bound)
        b = jax.random.uniform(kb, (1, fan_out), jnp.float32, -bound, bound)
        return w, b

    k1, k2, k3 = jax.random.split(key, 3)
    w1, b1 = linear(k1, 4, 64)
    w2, b2 = linear(k2, 64, 64)
    w3, b3 = linear(k3, 64, 2)
    return {"w1": w1, "b1": b1, "w2": w2, "b2": b2, "w3": w3, "b3": b3}


def net_forward_ref(x, p):
    """Pure-JAX reference for correctness checking."""
    h1 = jnp.maximum(x @ p["w1"] + p["b1"], 0.0)
    h2 = jnp.maximum(h1 @ p["w2"] + p["b2"], 0.0)
    return h2 @ p["w3"] + p["b3"]


if __name__ == "__main__":
    key = jax.random.PRNGKey(0)
    kx, kx2, kp = jax.random.split(key, 3)
    params = init_params(kp)

    # Small-batch check (single grid step, B=8 -> TB=8, no padding).
    B = 8
    x = jax.random.normal(kx, (B, 4), dtype=jnp.float32)
    out = jax.block_until_ready(net_forward(x, params))
    ref = net_forward_ref(x, params)
    assert out.shape == (B, 2), out.shape
    assert jnp.allclose(out, ref, atol=1e-4, rtol=1e-5), "mismatch vs reference (B=8)"

    # Mid-size batch exercising the >=2-step grid + batch-padding path
    # (600 -> TB=304, Bp=608, grid=(2,)).
    B2 = 600
    x2 = jax.random.normal(kx2, (B2, 4), dtype=jnp.float32)
    out2 = jax.block_until_ready(net_forward(x2, params))
    ref2 = net_forward_ref(x2, params)
    assert out2.shape == (B2, 2), out2.shape
    assert jnp.allclose(out2, ref2, atol=1e-4, rtol=1e-5), "mismatch vs reference (B=600)"

    print("KERNEL_OK")
</pallas_src>

<mosaic_0001>
module attributes {stable_mosaic.version = 11 : i64} {
  func.func @mlp_kernel(%arg0: i32, %arg1: memref<8x4xf32, #tpu.memory_space<vmem>>, %arg2: memref<4x64xf32, #tpu.memory_space<vmem>>, %arg3: memref<1x64xf32, #tpu.memory_space<vmem>>, %arg4: memref<64x64xf32, #tpu.memory_space<vmem>>, %arg5: memref<1x64xf32, #tpu.memory_space<vmem>>, %arg6: memref<64x2xf32, #tpu.memory_space<vmem>>, %arg7: memref<1x2xf32, #tpu.memory_space<vmem>>, %arg8: memref<8x2xf32, #tpu.memory_space<vmem>>) attributes {dimension_semantics = [#tpu.dimension_semantics<parallel>], iteration_bounds = array<i64: 1>, scalar_prefetch = 0 : i64, scratch_operands = 0 : i64, tpu.core_type = #tpu.core_type<tc>, window_params = [{transform_indices = @transform_0, window_bounds = array<i64: 8, 4>}, {pipeline_mode = #tpu.pipeline_mode<synchronous>, transform_indices = @transform_1, window_bounds = array<i64: 4, 64>}, {pipeline_mode = #tpu.pipeline_mode<synchronous>, transform_indices = @transform_2, window_bounds = array<i64: 1, 64>}, {pipeline_mode = #tpu.pipeline_mode<synchronous>, transform_indices = @transform_3, window_bounds = array<i64: 64, 64>}, {pipeline_mode = #tpu.pipeline_mode<synchronous>, transform_indices = @transform_4, window_bounds = array<i64: 1, 64>}, {pipeline_mode = #tpu.pipeline_mode<synchronous>, transform_indices = @transform_5, window_bounds = array<i64: 64, 2>}, {pipeline_mode = #tpu.pipeline_mode<synchronous>, transform_indices = @transform_6, window_bounds = array<i64: 1, 2>}, {transform_indices = @transform_7, window_bounds = array<i64: 8, 2>}]} {
    %c0 = arith.constant 0 : index
    %c0_0 = arith.constant 0 : index
    %0 = vector.load %arg1[%c0, %c0_0] : memref<8x4xf32, #tpu.memory_space<vmem>>, vector<8x4xf32>
    %c0_1 = arith.constant 0 : index
    %c0_2 = arith.constant 0 : index
    %1 = vector.load %arg2[%c0_1, %c0_2] : memref<4x64xf32, #tpu.memory_space<vmem>>, vector<4x64xf32>
    %cst = arith.constant dense<0.000000e+00> : vector<8x64xf32>
    %2 = tpu.matmul %0, %1, %cst {dimension_numbers = #tpu.dot_dimension_numbers<[1], [0], [0], [1], [0, 0, 1, 1], [], []>} : vector<8x4xf32>, vector<4x64xf32>, vector<8x64xf32> -> vector<8x64xf32>
    %c0_3 = arith.constant 0 : index
    %c0_4 = arith.constant 0 : index
    %3 = vector.load %arg3[%c0_3, %c0_4] : memref<1x64xf32, #tpu.memory_space<vmem>>, vector<1x64xf32>
    %4 = vector.broadcast %3 : vector<1x64xf32> to vector<8x64xf32>
    %5 = arith.addf %2, %4 : vector<8x64xf32>
    %cst_5 = arith.constant 0.000000e+00 : f32
    %6 = vector.broadcast %cst_5 : f32 to vector<8x64xf32>
    %7 = arith.maximumf %5, %6 : vector<8x64xf32>
    %c0_6 = arith.constant 0 : index
    %c0_7 = arith.constant 0 : index
    %8 = vector.load %arg4[%c0_6, %c0_7] : memref<64x64xf32, #tpu.memory_space<vmem>>, vector<64x64xf32>
    %cst_8 = arith.constant dense<0.000000e+00> : vector<8x64xf32>
    %9 = tpu.matmul %7, %8, %cst_8 {dimension_numbers = #tpu.dot_dimension_numbers<[1], [0], [0], [1], [0, 0, 1, 1], [], []>} : vector<8x64xf32>, vector<64x64xf32>, vector<8x64xf32> -> vector<8x64xf32>
    %c0_9 = arith.constant 0 : index
    %c0_10 = arith.constant 0 : index
    %10 = vector.load %arg5[%c0_9, %c0_10] : memref<1x64xf32, #tpu.memory_space<vmem>>, vector<1x64xf32>
    %11 = vector.broadcast %10 : vector<1x64xf32> to vector<8x64xf32>
    %12 = arith.addf %9, %11 : vector<8x64xf32>
    %cst_11 = arith.constant 0.000000e+00 : f32
    %13 = vector.broadcast %cst_11 : f32 to vector<8x64xf32>
    %14 = arith.maximumf %12, %13 : vector<8x64xf32>
    %c0_12 = arith.constant 0 : index
    %c0_13 = arith.constant 0 : index
    %15 = vector.load %arg6[%c0_12, %c0_13] : memref<64x2xf32, #tpu.memory_space<vmem>>, vector<64x2xf32>
    %cst_14 = arith.constant dense<0.000000e+00> : vector<8x2xf32>
    %16 = tpu.matmul %14, %15, %cst_14 {dimension_numbers = #tpu.dot_dimension_numbers<[1], [0], [0], [1], [0, 0, 1, 1], [], []>} : vector<8x64xf32>, vector<64x2xf32>, vector<8x2xf32> -> vector<8x2xf32>
    %c0_15 = arith.constant 0 : index
    %c0_16 = arith.constant 0 : index
    %17 = vector.load %arg7[%c0_15, %c0_16] : memref<1x2xf32, #tpu.memory_space<vmem>>, vector<1x2xf32>
    %18 = vector.broadcast %17 : vector<1x2xf32> to vector<8x2xf32>
    %19 = arith.addf %16, %18 : vector<8x2xf32>
    %c0_17 = arith.constant 0 : index
    %c0_18 = arith.constant 0 : index
    %20 = vector.load %arg8[%c0_17, %c0_18] : memref<8x2xf32, #tpu.memory_space<vmem>>, vector<8x2xf32>
    tpu.vector_store %arg8[%c0_17, %c0_18], %19 {strides = array<i32>} : memref<8x2xf32, #tpu.memory_space<vmem>>, vector<8x2xf32>,
    return
  }
  func.func @transform_0(%arg0: i32) -> (i32, i32) {
    %c0_i32 = arith.constant 0 : i32
    %c0_i32_0 = arith.constant 0 : i32
    return %arg0, %c0_i32 : i32, i32
  }
  func.func @transform_1(%arg0: i32) -> (i32, i32) {
    %c0_i32 = arith.constant 0 : i32
    %c0_i32_0 = arith.constant 0 : i32
    %c0_i32_1 = arith.constant 0 : i32
    return %c0_i32, %c0_i32_0 : i32, i32
  }
  func.func @transform_2(%arg0: i32) -> (i32, i32) {
    %c0_i32 = arith.constant 0 : i32
    %c0_i32_0 = arith.constant 0 : i32
    %c0_i32_1 = arith.constant 0 : i32
    return %c0_i32, %c0_i32_0 : i32, i32
  }
  func.func @transform_3(%arg0: i32) -> (i32, i32) {
    %c0_i32 = arith.constant 0 : i32
    %c0_i32_0 = arith.constant 0 : i32
    %c0_i32_1 = arith.constant 0 : i32
    return %c0_i32, %c0_i32_0 : i32, i32
  }
  func.func @transform_4(%arg0: i32) -> (i32, i32) {
    %c0_i32 = arith.constant 0 : i32
    %c0_i32_0 = arith.constant 0 : i32
    %c0_i32_1 = arith.constant 0 : i32
    return %c0_i32, %c0_i32_0 : i32, i32
  }
  func.func @transform_5(%arg0: i32) -> (i32, i32) {
    %c0_i32 = arith.constant 0 : i32
    %c0_i32_0 = arith.constant 0 : i32
    %c0_i32_1 = arith.constant 0 : i32
    return %c0_i32, %c0_i32_0 : i32, i32
  }
  func.func @transform_6(%arg0: i32) -> (i32, i32) {
    %c0_i32 = arith.constant 0 : i32
    %c0_i32_0 = arith.constant 0 : i32
    %c0_i32_1 = arith.constant 0 : i32
    return %c0_i32, %c0_i32_0 : i32, i32
  }
  func.func @transform_7(%arg0: i32) -> (i32, i32) {
    %c0_i32 = arith.constant 0 : i32
    %c0_i32_0 = arith.constant 0 : i32
    return %arg0, %c0_i32 : i32, i32
  }
}

</mosaic_0001>

<bundles_post_ra>
// kernel: net_forward.1
= control target key start
LH: loop header
LB: loop body
LE: loop exit
PB: predicated region body
PF: predicated region fallthrough
CT: control target
= control target key end

     0   :  { %vm39_vm0 = vcmask 1043456   ;;  %vm35_vm1 = vcmask 31744   ;;  %v395_v0 = vmov 0.0   ;;  %vm396_vm2 = vmmov 0   ;;  %s504_s1 = inlined_call_operand.vmem [shape: f32[4,64], index: 1, kind: input, shape index: {}]   ;;  %s505_s0 = inlined_call_operand.vmem [shape: f32[8,4], index: 0, kind: input, shape index: {}]   ;;  %s506_s3 = inlined_call_operand.vmem [shape: f32[64,64], index: 3, kind: input, shape index: {}]   ;;  %s507_s5 = inlined_call_operand.vmem [shape: f32[64,2], index: 5, kind: input, shape index: {}]   ;;  %s508_s2 = inlined_call_operand.vmem [shape: f32[1,64], index: 2, kind: input, shape index: {}]   ;;  %s509_s4 = inlined_call_operand.vmem [shape: f32[1,64], index: 4, kind: input, shape index: {}]   ;;  %s510_s6 = inlined_call_operand.vmem [shape: f32[1,2], index: 6, kind: input, shape index: {}]   ;;  %s511_s7 = inlined_call_operand.vmem [shape: f32[8,2], index: 7, kind: output, shape index: {}]  }
   0x1   :  { %325 = vmatprep.subr.mxu0 %v395_v0  ;;  %v27_v1 = vld [vmem:[%s504_s1] sm:$0xf]  ;;  %327 = vmatprep.mubr.msk.f32.mxu0 %vm396_vm2, %v395_v0  ;;  %v397_v4 = vmov 0.0|0.0   ;;  %v115_v5 = vld [vmem:[%s506_s3 + $0x8] sm:$0xff]  ;;  %v116_v6 = vld [vmem:[%s506_s3 + $0x10] sm:$0xff]  ;;  %vm129_vm3 = vcmask 523264  }
   0x2   :  { %v26_v2 = vld [vmem:[%s505_s0] sm:$0xff]  ;;  %326 = vmatpush3.msk.msra.mxu0 %vm39_vm0, %v27_v1  ;;  %368 = vmatprep.subr.bf16.mxu1 %v397_v4  ;;  %v117_v7 = vld [vmem:[%s506_s3 + $0x18] sm:$0xff]  ;;  %v119_v11 = vld [vmem:[%s506_s3 + $0x28] sm:$0xff]  ;;  %vm292_vm4 = vcmask 15360  }
   0x3   :  { %v114_v3 = vld [vmem:[%s506_s3] sm:$0xff]  ;;  %328 = vmatmul.mubr.msk.f32.vlgmr.msra.gmra.mrb[0].mxu0 %vm35_vm1, %v26_v2  ;;  %346 = vmatprep.mubr.msk.f32.mxu1 %vm396_vm2, %v395_v0  ;;  %v372_v9 = vpack.c.bf16 %v117_v7, %v116_v6  ;;  %v120_v13 = vld [vmem:[%s506_s3 + $0x30] sm:$0xff]  ;;  %v121_v14 = vld [vmem:[%s506_s3 + $0x38] sm:$0xff] }
   0x4   :  { %v369_v8 = vpack.c.bf16 %v115_v5, %v114_v3  ;;  %380 = vmatprep.subr.bf16.mxu0 %v397_v4  ;;  %365 = vmatprep.mubr.msk.f32.mxu0 %vm396_vm2, %v395_v0  ;;  %v118_v10 = vld [vmem:[%s506_s3 + $0x20] sm:$0xff]  ;;  %v378_v15 = vpack.c.bf16 %v121_v14, %v120_v13  ;;  %v205_v17 = vld [vmem:[%s507_s5 + $0x8] sm:$0xff]  ;;  %v206_v18 = vld [vmem:[%s507_s5 + $0x10] sm:$0xff] }
   0x5   :  { %v375_v12 = vpack.c.bf16 %v119_v11, %v118_v10  ;;  %v204_v16 = vld [vmem:[%s507_s5] sm:$0xff]  ;;  %v207_v20 = vld [vmem:[%s507_s5 + $0x18] sm:$0xff]  ;;  %v209_v23 = vld [vmem:[%s507_s5 + $0x28] sm:$0xff] }
   0x6   :  { %370 = vmatpush3.bf16.msra.mxu1 %v369_v8  ;;  %v381_v19 = vpack.c.bf16 %v205_v17, %v204_v16  ;;  %v384_v21 = vpack.c.bf16 %v207_v20, %v206_v18  ;;  %v208_v22 = vld [vmem:[%s507_s5 + $0x20] sm:$0xff]  ;;  %v210_v30 = vld [vmem:[%s507_s5 + $0x30] sm:$0xff]  ;;  %v211_v31 = vld [vmem:[%s507_s5 + $0x38] sm:$0xff] }
   0x7   :  { %371 = vmatprep.subr.bf16.mxu1 %v397_v4  ;;  %v387_v24 = vpack.c.bf16 %v209_v23, %v208_v22  ;;  %v298_v25 = vld [vmem:[%s508_s2] ss:$0 sm:$0xff]  ;;  %v390_v32 = vpack.c.bf16 %v211_v31, %v210_v30 }
   0x8   :  { %382 = vmatpush3.bf16.msra.mxu0 %v381_v19  ;;  %v301_v33 = vld [vmem:[%s509_s4] ss:$0 sm:$0xff] }
   0x9   :  { %383 = vmatprep.subr.bf16.mxu0 %v397_v4  ;;  %v303_v38 = vld [vmem:[%s510_s6] ss:$0 sm:$0xff] }
   0xa   :  { %373 = vmatpush3.bf16.msra.mxu1 %v372_v9 }
   0xb   :  { %374 = vmatprep.subr.bf16.mxu1 %v397_v4 }
   0xc   :  { %385 = vmatpush3.bf16.msra.mxu0 %v384_v21 }
   0xd   :  { %386 = vmatprep.subr.bf16.mxu0 %v397_v4 }
   0xe   :  { %376 = vmatpush3.bf16.msra.mxu1 %v375_v12 }
   0xf   :  { %377 = vmatprep.subr.bf16.mxu1 %v397_v4 }
  0x10   :  { %388 = vmatpush3.bf16.msra.mxu0 %v387_v24 }
  0x11   :  { %389 = vmatprep.subr.bf16.mxu0 %v397_v4 }
  0x12   :  { %379 = vmatpush3.bf16.msra.mxu1 %v378_v15 }
  0x14   :  { %391 = vmatpush3.bf16.msra.mxu0 %v390_v32 }
  0xd6   :  { %v109_v26 = vpop.f32.mrb[0].mxu0 }
  0xd7   :  { %v110_v27 = vadd.f32 %v298_v25, %v109_v26  ;;  %v329_v28 = vpop.f32.mrb[1].mxu0 }
  0xd9   :  { %v113_v29 = vmax.f32 %v110_v27, 0.0 }
  0xdb   :  { %347 = vmatmul.mubr.msk.f32.vlgmr.msra.gmra.mrb[0].mxu1 %vm129_vm3, %v113_v29 }
 0x1ae   :  { %v199_v34 = vpop.f32.mrb[0].mxu1 }
 0x1af   :  { %v200_v35 = vadd.f32 %v301_v33, %v199_v34  ;;  %v348_v36 = vpop.f32.mrb[1].mxu1 }
 0x1b1   :  { %v203_v37 = vmax.f32 %v200_v35, 0.0 }
 0x1b3   :  { %366 = vmatmul.mubr.msk.f32.vlgmr.msra.gmra.mrb[2].mxu0 %vm129_vm3, %v203_v37 }
 0x286   :  { %v288_v39 = vpop.f32.mrb[2].mxu0 }
 0x287   :  { %v289_v40 = vadd.f32 %v303_v38, %v288_v39  ;;  %v367_v41 = vpop.f32.mrb[3].mxu0 }
 0x289   :  { %293 = vst.msk [vmem:[%s511_s7] sm:$0xff] %vm292_vm4, %v289_v40 }

</bundles_post_ra>
